<compile_context>
chip_gen: v5e
topology: v5e:2x2
jax: 0.10.0
libtpu: 0.0.40
codegen_flags: <defaults>
</compile_context>

<pallas_src>
import jax
import jax.numpy as jnp
from jax.experimental import pallas as pl
from jax.experimental.pallas import tpu as pltpu


def _se_kernel(x_ref, w1t_ref, w2t_ref, o_ref):
    # x_ref : (B_TILE, C, HW)  batch tile
    # w1t_ref: (C, hidden)     fc1 weight, pre-transposed (torch layout is (hidden, C))
    # w2t_ref: (hidden, C)     fc2 weight, pre-transposed (torch layout is (C, hidden))
    # o_ref : (B_TILE, C, HW)
    x = x_ref[...]
    hw = x.shape[-1]
    xf = x.astype(jnp.float32)  # accumulate the mean in f32 even for bf16 inputs

    # global average pool over spatial dims -> (B_TILE, C)
    pooled = jnp.sum(xf, axis=-1) * (1.0 / float(hw))

    # fc1 (no bias) + ReLU : (B_TILE, C) @ (C, hidden) -> (B_TILE, hidden)
    h = jnp.dot(pooled, w1t_ref[...], preferred_element_type=jnp.float32)
    h = jnp.maximum(h, 0.0)

    # fc2 (no bias) + Sigmoid : (B_TILE, hidden) @ (hidden, C) -> (B_TILE, C)
    s = jnp.dot(h, w2t_ref[...], preferred_element_type=jnp.float32)
    s = jax.nn.sigmoid(s)

    # per-channel rescale, broadcast along the lane (spatial) axis
    o_ref[...] = (xf * s[:, :, None]).astype(o_ref.dtype)


def _choose_b_tile(B, C, hw, dtype_bytes):
    """Largest batch tile that (a) divides B, (b) keeps one block <= ~8 MiB
    (so double-buffered in+out ~<= 32 MiB, safe on v7x's 64 MiB VMEM), and
    (c) when possible leaves a grid of length >= 2 for the two v7x TCs."""
    block_budget = 8 * 1024 * 1024
    divisors = [d for d in range(1, B + 1) if B % d == 0]
    fitting = [d for d in divisors if d * C * hw * dtype_bytes <= block_budget]
    if not fitting:
        fitting = [1]
    multi = [d for d in fitting if B // d >= 2]
    pool = multi if multi else fitting
    return max(pool)


def se_layer(x, w1, w2):
    """x: (B, C, H, W); w1: (C//r, C) torch fc1 weight; w2: (C, C//r) torch fc2 weight."""
    B, C, H, W = x.shape
    hidden = w1.shape[0]
    hw = H * W
    dtype_bytes = jnp.dtype(x.dtype).itemsize

    x2 = x.reshape(B, C, hw)
    w1t = jnp.transpose(w1)  # (C, hidden)
    w2t = jnp.transpose(w2)  # (hidden, C)

    b_tile = _choose_b_tile(B, C, hw, dtype_bytes)
    grid = (B // b_tile,)

    block_bytes = b_tile * C * hw * dtype_bytes
    w_bytes = 2 * C * hidden * jnp.dtype(w1.dtype).itemsize
    # 2x double-buffered input blocks + 2x output blocks + (double-buffered)
    # weights + headroom; explicitly raise above the scoped default.
    vmem_limit = int(max(4 * block_bytes + 4 * w_bytes + (2 << 20), 32 << 20))

    cost = pl.CostEstimate(
        flops=2 * B * C * hw + 4 * B * C * hidden,
        transcendentals=B * C,
        bytes_accessed=2 * B * C * hw * dtype_bytes + w_bytes,
    )

    out = pl.pallas_call(
        _se_kernel,
        out_shape=jax.ShapeDtypeStruct((B, C, hw), x.dtype),
        grid_spec=pltpu.PrefetchScalarGridSpec(
            num_scalar_prefetch=0,
            grid=grid,
            in_specs=[
                pl.BlockSpec((b_tile, C, hw), lambda b: (b, 0, 0)),
                pl.BlockSpec((C, hidden), lambda b: (0, 0)),
                pl.BlockSpec((hidden, C), lambda b: (0, 0)),
            ],
            out_specs=pl.BlockSpec((b_tile, C, hw), lambda b: (b, 0, 0)),
        ),
        compiler_params=pltpu.CompilerParams(
            dimension_semantics=("parallel",),
            vmem_limit_bytes=vmem_limit,
        ),
        cost_estimate=cost,
    )(x2, w1t, w2t)
    return out.reshape(B, C, H, W)


def _reference(x, w1, w2):
    y = jnp.mean(x, axis=(-1, -2))                 # (B, C)
    y = jnp.maximum(y @ w1.T, 0.0)                 # (B, hidden)
    y = jax.nn.sigmoid(y @ w2.T)                   # (B, C)
    return x * y[:, :, None, None]


if __name__ == "__main__":
    # SELayer(channel=32, reduction=16) -> hidden = 2
    B, C, H, W = 2, 32, 16, 16
    reduction = 16
    hidden = C // reduction

    key = jax.random.PRNGKey(0)
    kx, k1, k2 = jax.random.split(key, 3)
    x = jax.random.normal(kx, (B, C, H, W), dtype=jnp.float32)
    # torch Linear layout: (out_features, in_features)
    w1 = 0.1 * jax.random.normal(k1, (hidden, C), dtype=jnp.float32)
    w2 = 0.1 * jax.random.normal(k2, (C, hidden), dtype=jnp.float32)

    out = se_layer(x, w1, w2)
    out = jax.block_until_ready(out)

    ref = _reference(x, w1, w2)
    assert out.shape == (B, C, H, W)
    assert jnp.allclose(out, ref, rtol=1e-5, atol=1e-5)
    print("KERNEL_OK")
</pallas_src>

<mosaic_0001>
module attributes {stable_mosaic.version = 11 : i64} {
  func.func @_se_kernel(%arg0: i32, %arg1: memref<1x32x256xf32, #tpu.memory_space<vmem>>, %arg2: memref<32x2xf32, #tpu.memory_space<vmem>>, %arg3: memref<2x32xf32, #tpu.memory_space<vmem>>, %arg4: memref<1x32x256xf32, #tpu.memory_space<vmem>>) attributes {dimension_semantics = [#tpu.dimension_semantics<parallel>], iteration_bounds = array<i64: 2>, scalar_prefetch = 0 : i64, scratch_operands = 0 : i64, tpu.core_type = #tpu.core_type<tc>, window_params = [{transform_indices = @transform_0, window_bounds = array<i64: 1, 32, 256>}, {pipeline_mode = #tpu.pipeline_mode<synchronous>, transform_indices = @transform_1, window_bounds = array<i64: 32, 2>}, {pipeline_mode = #tpu.pipeline_mode<synchronous>, transform_indices = @transform_2, window_bounds = array<i64: 2, 32>}, {transform_indices = @transform_3, window_bounds = array<i64: 1, 32, 256>}]} {
    %c0 = arith.constant 0 : index
    %c0_0 = arith.constant 0 : index
    %c0_1 = arith.constant 0 : index
    %0 = vector.load %arg1[%c0, %c0_0, %c0_1] : memref<1x32x256xf32, #tpu.memory_space<vmem>>, vector<1x32x256xf32>
    %cst = arith.constant dense<0.000000e+00> : vector<1x32xf32>
    %1 = vector.multi_reduction <add>, %0, %cst [2] : vector<1x32x256xf32> to vector<1x32xf32>
    %cst_2 = arith.constant 3.906250e-03 : f32
    %2 = vector.broadcast %cst_2 : f32 to vector<1x32xf32>
    %3 = arith.mulf %1, %2 : vector<1x32xf32>
    %c0_3 = arith.constant 0 : index
    %c0_4 = arith.constant 0 : index
    %4 = vector.load %arg2[%c0_3, %c0_4] : memref<32x2xf32, #tpu.memory_space<vmem>>, vector<32x2xf32>
    %cst_5 = arith.constant dense<0.000000e+00> : vector<1x2xf32>
    %5 = tpu.matmul %3, %4, %cst_5 {dimension_numbers = #tpu.dot_dimension_numbers<[1], [0], [0], [1], [0, 0, 1, 1], [], []>} : vector<1x32xf32>, vector<32x2xf32>, vector<1x2xf32> -> vector<1x2xf32>
    %cst_6 = arith.constant 0.000000e+00 : f32
    %6 = vector.broadcast %cst_6 : f32 to vector<1x2xf32>
    %7 = arith.maximumf %5, %6 : vector<1x2xf32>
    %c0_7 = arith.constant 0 : index
    %c0_8 = arith.constant 0 : index
    %8 = vector.load %arg3[%c0_7, %c0_8] : memref<2x32xf32, #tpu.memory_space<vmem>>, vector<2x32xf32>
    %cst_9 = arith.constant dense<0.000000e+00> : vector<1x32xf32>
    %9 = tpu.matmul %7, %8, %cst_9 {dimension_numbers = #tpu.dot_dimension_numbers<[1], [0], [0], [1], [0, 0, 1, 1], [], []>} : vector<1x2xf32>, vector<2x32xf32>, vector<1x32xf32> -> vector<1x32xf32>
    %10 = arith.negf %9 : vector<1x32xf32>
    %11 = math.exp %10 : vector<1x32xf32>
    %cst_10 = arith.constant 1.000000e+00 : f32
    %12 = vector.broadcast %cst_10 : f32 to vector<1x32xf32>
    %13 = arith.addf %12, %11 : vector<1x32xf32>
    %14 = arith.divf %12, %13 : vector<1x32xf32>
    %15 = vector.shape_cast %14 : vector<1x32xf32> to vector<1x32x1xf32>
    %16 = vector.broadcast %15 : vector<1x32x1xf32> to vector<1x32x256xf32>
    %17 = arith.mulf %0, %16 : vector<1x32x256xf32>
    %c0_11 = arith.constant 0 : index
    %c0_12 = arith.constant 0 : index
    %c0_13 = arith.constant 0 : index
    %18 = vector.load %arg4[%c0_11, %c0_12, %c0_13] : memref<1x32x256xf32, #tpu.memory_space<vmem>>, vector<1x32x256xf32>
    tpu.vector_store %arg4[%c0_11, %c0_12, %c0_13], %17 {strides = array<i32>} : memref<1x32x256xf32, #tpu.memory_space<vmem>>, vector<1x32x256xf32>,
    return
  }
  func.func @transform_0(%arg0: i32) -> (i32, i32, i32) {
    %c0_i32 = arith.constant 0 : i32
    %c0_i32_0 = arith.constant 0 : i32
    %c0_i32_1 = arith.constant 0 : i32
    return %arg0, %c0_i32, %c0_i32_0 : i32, i32, i32
  }
  func.func @transform_1(%arg0: i32) -> (i32, i32) {
    %c0_i32 = arith.constant 0 : i32
    %c0_i32_0 = arith.constant 0 : i32
    %c0_i32_1 = arith.constant 0 : i32
    return %c0_i32, %c0_i32_0 : i32, i32
  }
  func.func @transform_2(%arg0: i32) -> (i32, i32) {
    %c0_i32 = arith.constant 0 : i32
    %c0_i32_0 = arith.constant 0 : i32
    %c0_i32_1 = arith.constant 0 : i32
    return %c0_i32, %c0_i32_0 : i32, i32
  }
  func.func @transform_3(%arg0: i32) -> (i32, i32, i32) {
    %c0_i32 = arith.constant 0 : i32
    %c0_i32_0 = arith.constant 0 : i32
    %c0_i32_1 = arith.constant 0 : i32
    return %arg0, %c0_i32, %c0_i32_0 : i32, i32, i32
  }
}

</mosaic_0001>

<bundles_post_ra>
// kernel: tpu_custom_call.1
= control target key start
LH: loop header
LB: loop body
LE: loop exit
PB: predicated region body
PF: predicated region fallthrough
CT: control target
= control target key end

     0   :  { %8 = vsyncpa [#allocation3], 0  ;;  %s819_s0 = inlined_call_operand.hbm [shape: f32[2,32,256], index: 0, kind: input, shape index: {}]   ;;  %s820_s1 = inlined_call_operand.vmem [shape: f32[32,2], index: 1, kind: input, shape index: {}]   ;;  %s821_s2 = inlined_call_operand.vmem [shape: f32[2,32], index: 2, kind: input, shape index: {}]   ;;  %s822_s3 = inlined_call_operand.hbm [shape: f32[2,32,256], index: 3, kind: output, shape index: {}]  }
   0x1   :  { %10 = vsyncpa [#allocation3 + $0x1], 0 }
   0x2   :  { %11 = vsyncpa [#allocation4], 0 }
   0x3   :  { %13 = vsyncpa [#allocation4 + $0x1], 0  ;;  %s641_s12 = smov 0   ;;  %s643_s13 = smov 0  }
   0x4   :  { %s645_s14 = smov 0   ;;  %s647_s15 = smov 0  }
   0x5 LB: > { %s662_s16 = sadd.s32 4294967295, %s615_s15   ;;  %s440_s17 = sadd.s32 4294967294, %s615_s15   ;;  %s615_s15 = sphi %s647_s15, %s832_s15   ;;  %s611_s14 = sphi %s645_s14, %s831_s14   ;;  %s607_s13 = sphi %s643_s13, %s830_s13   ;;  %s603_s12 = sphi %s641_s12, %s829_s12  }
   0x6   : > { %s666_s18 = sadd.s32 1, %s615_s15   ;;  %s26_s19 = sadd.s32 1, %s611_s14 }
   0x7   : > { %s23_s20 = ssub.s32 %s615_s15, %s666_s18  ;;  %p33_p0 = scmp.ne.s32.totalorder %s611_s14, %s607_s13 }
   0x8   : > { %p24_p1 = scmp.eq.s32.totalorder %s23_s20, 0  ;;  %p34_p2 = scmp.eq.s32.totalorder %s615_s15, 0 }
   0x9   : > { %p39_p3 = scmp.ne.s32.totalorder %s607_s13, %s603_s12  ;;  %p40_p4 = scmp.eq.s32.totalorder %s662_s16, 0 }
   0xa   : > { %s678_s21 = scalar_select %p24_p1, %s611_s14, %s26_s19  }
   0xb   : > { %p680_p5 = por %p34_p2, %p33_p0  ;;  %p684_p6 = por %p40_p4, %p39_p3 }
   0xc   : > { %p105_p7 = scmp.eq.s32.totalorder %s662_s16, 1  ;;  %p111_p8 = scmp.eq.s32.totalorder %s440_s17, 1 }
   0xd   : > { %p472_p10 = scmp.lt.s32.totalorder %s615_s15, 2  ;;  %s137_s26 = sand.u32 1, %s611_s14  }
   0xe   : > { %p691_p11 = por %p105_p7, %p33_p0  ;;  %p695_p12 = por %p111_p8, %p39_p3 }
   0xf   : > { %s458_s27 = sshll.u32 %s615_s15, 6  ;;  %s443_s28 = sshll.u32 %s137_s26, 6 }
  0x10   : > { %s146_s4 = scalar_lea.hbm %s819_s0, %s458_s27  ;;  %s141_s6 = scalar_lea.vmem [#allocation2], %s443_s28 }
  0x11   : > { %s147_s5 = sshll.u32 %s146_s4, 4  ;;  %s149_s7 = sshll.u32 %s141_s6, 4  ;;  %s148_s5 = int_to_ptr.hbm [resolvable:$true] %s147_s5  ;;  %s150_s7 = int_to_ptr.vmem [resolvable:$true] %s149_s7 }
  0x12   : > { %p706_p13 = pnand %p472_p10, %p680_p5  ;;  %p446_p0 = scmp.ge.s32.totalorder %s615_s15, 1 }
  0x13   : > { %p157_p1 = scmp.lt.s32.totalorder %s615_s15, 3  ;;  %s138_s9 = scalar_lea.sflag [#allocation3], %s137_s26 }
  0x14   : > { %s519_s10 = sshra.s32 %s148_s5, 4  ;;  %p523_p3 = pneg %p706_p13  ;;  %s520_s10 = int_to_ptr.hbm [resolvable:$true] %s519_s10 }
  0x15   : > { %s521_s11 = scalar_lea.hbm %s520_s10, 64  ;;  %s526_s20 = scalar_lea.hbm %s819_s0, 128 }
  0x16   : > { %p522_p2 = scmp.ne.s32.totalorder %s520_s10, %s521_s11  ;;  %p527_p5 = scmp.lt.s32.totalorder %s520_s10, %s819_s0 }
  0x17   : > { %p528_p8 = scmp.lt.s32.totalorder %s526_s20, %s521_s11 }
  0x18   : > { %p524_p4 = pnand %p523_p3, %p522_p2 }
  0x19   : > { %p529_p10 = por %p528_p8, %p527_p5 }
  0x1a   : > { %p525_p7 = pneg %p524_p4 }
  0x1c   : > { %p530_p9 = pnand %p529_p10, %p525_p7 }
  0x1e   : > { %533 = shalt.err (!%p530_p9)
}
  0x1f   : > { %s617_s26 = smov 256   ;;  %s618_s28 = smov 16  }
  0x20   : > { %467 = dma.hbm_to_vmem [thread:$0]  (!%p706_p13), %s148_s5, 1024, %s150_s7, %s138_s9, %s617_s26, %s617_s26, %s618_s28  }
  0x21   : > { %p158_p2 = pnand %p446_p0, %p157_p1 }
  0x22   : > { %s727_s29 = sand.u32 (!%p158_p2), 1, %s607_s13  }
  0x23   : > { %161 = sbr.rel (%p158_p2) target bundleno = 583 (0x247), region = 32  ;;  %s447_s30 = sshll.u32 (!%p158_p2), %s727_s29, 6 }
  0x24   : > { %s164_s4 = scalar_lea.sflag (!%p158_p2), [#allocation3], %s727_s29  ;;  %s167_s6 = scalar_lea.vmem (!%p158_p2), [#allocation2], %s447_s30 }
  0x28   : > { %594 = dma.done.wait (%p684_p6), %s164_s4, 1024  }
  0x29   : > { %596 = vsyncadd (%p684_p6), %s164_s4, 4294966272  ;;  %v737_v0 = vld [vmem:[%s167_s6] sm:$0xff]  ;;  %v739_v1 = vld [vmem:[%s167_s6 + $0x8] sm:$0xff]  ;;  %v223_v16 = vlaneseq  ;;  %vm228_vm0 = vcmask 130112   ;;  %vm232_vm1 = vcmask 195712   ;;  %vm236_vm2 = vcmask 261312  }
  0x2a   : > { %v741_v2 = vld [vmem:[%s167_s6 + $0x20] sm:$0xff]  ;;  %v199_v3 = vadd.f32 %v739_v1, %v737_v0  ;;  %v745_v4 = vld [vmem:[%s167_s6 + $0x28] sm:$0xff]  ;;  %v749_v6 = vld [vmem:[%s167_s6 + $0x10] sm:$0xff]  ;;  %vm238_vm3 = vcmask 261120   ;;  %vm267_vm4 = vcmask 1041408   ;;  %vm263_vm5 = vcmask 15360  }
  0x2b   : > { %v205_v5 = vadd.f32 %v745_v4, %v741_v2  ;;  %v751_v7 = vld [vmem:[%s167_s6 + $0x18] sm:$0xff]  ;;  %v753_v8 = vld [vmem:[%s167_s6 + $0x30] sm:$0xff]  ;;  %v216_v14 = vld [vmem:[%s820_s1 + $0x8] sm:$0xff]  ;;  %v224_v19 = vand.u32 127, %v223_v16  ;;  %v312_v39 = vshrl.u32 %v223_v16, 7  ;;  %s190_s22 = scalar_lea.vmem [#allocation5], %s447_s30 }
  0x2c   : > { %200 = vadd.xlane.f32.xlu0 %v199_v3  ;;  %v755_v9 = vld [vmem:[%s167_s6 + $0x38] sm:$0xff]  ;;  %v202_v10 = vadd.f32 %v751_v7, %v749_v6  ;;  %v217_v13 = vld [vmem:[%s820_s1 + $0x10] sm:$0xff]  ;;  %v215_v15 = vld [vmem:[%s820_s1] sm:$0xff]  ;;  %s459_s27 = sshll.u32 %s662_s16, 6  ;;  %s364_s6 = sshll.u32 %s190_s22, 4  ;;  %s365_s6 = int_to_ptr.vmem [resolvable:$true] %s364_s6 }
  0x2d   : > { %206 = vadd.xlane.f32.xlu1 %v205_v5  ;;  %v208_v11 = vadd.f32 %v755_v9, %v753_v8  ;;  %v218_v12 = vld [vmem:[%s820_s1 + $0x18] sm:$0xff]  ;;  %v226_v21 = vadd.s32 4294967288, %v224_v19  ;;  %v230_v22 = vadd.s32 4294967280, %v224_v19  ;;  %v234_v25 = vadd.s32 4294967272, %v224_v19  ;;  %v262_v36 = vld [vmem:[%s821_s2] sm:$0x3]  ;;  %510 = vset.pattern.permute.xlu2 %v312_v39  ;;  %s363_s4 = scalar_lea.hbm %s822_s3, %s459_s27 }
  0x2e   : > { %253 = vmatpush.msra.mxu0 %v218_v12  ;;  %450 = vmatpush.msk.msra.mxu1 %vm267_vm4, %v262_v36  ;;  %v331_v40 = vadd.s32 24, %v312_v39  ;;  %v325_v41 = vadd.s32 16, %v312_v39  ;;  %v319_v57 = vadd.s32 8, %v312_v39  ;;  %s366_s23 = sshll.u32 %s363_s4, 4  ;;  %s352_s16 = scalar_lea.sflag [#allocation4], %s727_s29  ;;  %s367_s23 = int_to_ptr.hbm [resolvable:$true] %s366_s23 }
  0x2f   : > { %s563_s30 = sshra.s32 %s367_s23, 4  ;;  %s569_s9 = scalar_lea.hbm %s822_s3, 128  ;;  %s564_s30 = int_to_ptr.hbm [resolvable:$true] %s563_s30 }
  0x30   : > { %254 = vmatpush.msra.mxu0 %v217_v13  ;;  %513 = vset.pattern.permute.xlu1 %v331_v40  ;;  %s565_s5 = scalar_lea.hbm %s564_s30, 64  ;;  %p570_p0 = scmp.lt.s32.totalorder %s564_s30, %s822_s3 }
  0x31   : > { %512 = vset.pattern.permute.xlu0 %v325_v41  ;;  %p566_p6 = scmp.ne.s32.totalorder %s564_s30, %s565_s5  ;;  %p571_p1 = scmp.lt.s32.totalorder %s569_s9, %s565_s5 }
  0x32   : > { %255 = vmatpush.msra.mxu0 %v216_v14 }
  0x33   : > { %p567_p9 = pnand %p566_p6, %p691_p11  ;;  %p572_p3 = por %p571_p1, %p570_p0 }
  0x34   : > { %203 = vadd.xlane.f32.xlu0 %v202_v10  ;;  %256 = vmatpush.msra.mxu0 %v215_v15 }
  0x35   : > { %209 = vadd.xlane.f32.xlu1 %v208_v11  ;;  %p568_p13 = pneg %p567_p9 }
  0x37   : > { %p573_p4 = pnand %p572_p3, %p568_p13 }
  0x9f   : > { %v201_v17 = vpop.xlane.xlu0 %200 }
  0xa0   : > { %v207_v18 = vpop.xlane.xlu1 %206  ;;  %v211_v20 = vmul.f32 0.00390625, %v201_v17 }
  0xa1   : > { %v213_v23 = vmul.f32 0.00390625, %v207_v18 }
  0xa2   : > { %v225_v29 = vperm.slane %v211_v20, %v224_v19 }
  0xa3   : > { %v231_v31 = vperm.slane %v213_v23, %v230_v22 }
  0xa7   : > { %v204_v24 = vpop.xlane.xlu0 %203 }
  0xa8   : > { %v212_v26 = vmul.f32 0.00390625, %v204_v24  ;;  %v210_v27 = vpop.xlane.xlu1 %209 }
  0xa9   : > { %v214_v28 = vmul.f32 0.00390625, %v210_v27 }
  0xaa   : > { %v227_v30 = vperm.slane %v212_v26, %v226_v21 }
  0xab   : > { %v235_v32 = vperm.slane %v214_v28, %v234_v25 }
  0xac   : > { %v229_v33 = vsel %vm228_vm0, %v227_v30, %v225_v29 }
  0xad   : > { %v233_v34 = vsel %vm232_vm1, %v231_v31, %v229_v33 }
  0xae   : > { %v237_v35 = vsel %vm236_vm2, %v235_v32, %v233_v34 }
  0xaf   : > { %449 = vmatmul.msk.f32.vlgmr.msra.gmra.mxu0 %vm238_vm3, %v237_v35 }
 0x12c   : > { %v258_v37 = vpop.f32.mrf.mxu0 }
 0x12d   : > { %v261_v38 = vmax.f32 %v258_v37, 0.0 }
 0x12f   : > { %451 = vmatmul.msk.f32.vlgmr.msra.gmra.mxu1 %vm263_vm5, %v261_v38 }
 0x1ac   : > { %v288_v42 = vpop.f32.mrf.mxu1 }
 0x1ad   : > { %v452_v43 = vmul.f32 -1.442695, %v288_v42 }
 0x1af   : > { %515 = vpow2.f32 %v452_v43 }
 0x1b5   : > { %v516_v44 = vpop.eup %515 }
 0x1b6   : > { %v294_v45 = vadd.f32 1.0, %v516_v44 }
 0x1b8   : > { %517 = vrcp.f32 %v294_v45  ;;  %v306_v49 = vand.u32 2147483648, %v294_v45  ;;  %v304_v51 = vand.u32 2147483647, %v294_v45  ;;  %vm300_vm7 = vweird.f32 %v294_v45 }
 0x1ba   : > { %v307_v53 = vor.u32 1.1754944e-38, %v306_v49  ;;  %vm305_vm9 = vcmp.eq.f32.partialorder %v304_v51, 8.507059e+37 }
 0x1be   : > { %v518_v46 = vpop.eup %517 }
 0x1bf   : > { %v296_v47 = vmul.f32 %v518_v46, %v294_v45  ;;  %vm301_vm6 = vweird.f32 %v518_v46 }
 0x1c0   : > { %vm302_vm8 = vmor %vm300_vm7, %vm301_vm6 }
 0x1c1   : > { %v297_v48 = vsub.f32 1.0, %v296_v47 }
 0x1c3   : > { %v298_v50 = vmul.f32 %v518_v46, %v297_v48 }
 0x1c5   : > { %v299_v52 = vadd.f32 %v518_v46, %v298_v50 }
 0x1c7   : > { %v303_v54 = vsel %vm302_vm8, %v518_v46, %v299_v52 }
 0x1c8   : > { %v308_v55 = vsel %vm305_vm9, %v307_v53, %v303_v54 }
 0x1c9   : > { %v310_v56 = vperm.slane %v308_v55, 0 }
 0x1cb   : > { %333 = vperm.xlu1 %513, %v310_v56   ;;  %327 = vperm.xlu0 %512, %v310_v56  }
 0x1cc   : > { %315 = vperm.xlu2 %510, %v310_v56  }
 0x1d3   : > { %514 = vset.pattern.permute.xlu0 %v331_v40 }
 0x1d4   : > { %511 = vset.pattern.permute.xlu2 %v319_v57 }
 0x1dc   : > { %321 = vperm.xlu2 %511, %v310_v56  }
 0x226   : > { %v316_v58 = vpop.permute.xlu2 %315 }
 0x227   : > { %v335_v59 = vmul.f32 %v316_v58, %v737_v0  ;;  %v336_v60 = vmul.f32 %v316_v58, %v739_v1 }
 0x229   : > { %343 = vst [vmem:[%s190_s22] sm:$0xff] %v335_v59 }
 0x22a   : > { %344 = vst [vmem:[%s190_s22 + $0x8] sm:$0xff] %v336_v60 }
 0x236   : > { %v322_v61 = vpop.permute.xlu2 %321 }
 0x237   : > { %v337_v62 = vmul.f32 %v322_v61, %v749_v6  ;;  %v338_v63 = vmul.f32 %v322_v61, %v751_v7 }
 0x239   : > { %345 = vst [vmem:[%s190_s22 + $0x10] sm:$0xff] %v337_v62 }
 0x23a   : > { %346 = vst [vmem:[%s190_s22 + $0x18] sm:$0xff] %v338_v63 }
 0x23d   : > { %v334_v0 = vpop.permute.xlu1 %333  ;;  %v328_v1 = vpop.permute.xlu0 %327 }
 0x23e   : > { %v341_v3 = vmul.f32 %v334_v0, %v753_v8  ;;  %v342_v5 = vmul.f32 %v334_v0, %v755_v9  ;;  %v339_v6 = vmul.f32 %v328_v1, %v741_v2  ;;  %v340_v7 = vmul.f32 %v328_v1, %v745_v4 }
 0x240   : > { %349 = vst [vmem:[%s190_s22 + $0x30] sm:$0xff] %v341_v3 }
 0x241   : > { %350 = vst [vmem:[%s190_s22 + $0x38] sm:$0xff] %v342_v5 }
 0x242   : > { %347 = vst [vmem:[%s190_s22 + $0x20] sm:$0xff] %v339_v6 }
 0x243   : > { %348 = vst [vmem:[%s190_s22 + $0x28] sm:$0xff] %v340_v7 }
 0x244   : > { %576 = shalt.err (!%p573_p4)
}
 0x245   : > { %s619_s29 = smov 256   ;;  %s620_s17 = smov 16  }
 0x246   : > { %462 = dma.vmem_to_hbm [thread:$0]  (%p691_p11), %s365_s6, 1024, %s367_s23, %s352_s16, %s619_s29, %s619_s29, %s620_s17  }
 0x247 PF: > { %s381_s19 = sand.u32 1, %s603_s12   ;;  %p828_p7 = scmp.ge.s32.totalorder %s615_s15, 2 }
 0x248   : > { %s382_s20 = scalar_lea.sflag [#allocation4], %s381_s19 }
 0x249   : > { %p469_p5 = pnand %p828_p7, %p695_p12 }
 0x24b   : > { %p470_p8 = pneg %p469_p5 }
 0x24d   : > { %598 = dma.done.wait (%p470_p8), %s382_s20, 1024  }
 0x24e   : > { %600 = vsyncadd (%p470_p8), %s382_s20, 4294966272  ;;  %p16_p10 = scmp.ge.s32.totalorder %s666_s18, 4   ;;  %s829_s12 = smov %s607_s13 }
 0x24f   : > { %s830_s13 = smov %s611_s14  ;;  %s831_s14 = smov %s678_s21 }
 0x250   : > { %s832_s15 = smov %s666_s18  ;;  %18 = sbr.rel (!%p16_p10) target bundleno = 5 (0x5), region = 77 }
 0x255   :  { %388 = vsyncpa [#allocation3], 1 }
 0x256   :  { %390 = vsyncpa [#allocation3 + $0x1], 1 }
 0x257   :  { %391 = vsyncpa [#allocation4], 1 }
 0x258   :  { %393 = vsyncpa [#allocation4 + $0x1], 1 }

</bundles_post_ra>
